<compile_context>
chip_gen: v7x
topology: tpu7x:2x2x1
jax: 0.10.0
libtpu: 0.0.40
codegen_flags: <defaults>
</compile_context>

<pallas_src>
import functools
import math

import jax
import jax.numpy as jnp
from jax import lax
from jax.experimental import pallas as pl
from jax.experimental.pallas import tpu as pltpu


def _round_up(n, m):
    return ((n + m - 1) // m) * m


def _round_down(n, m):
    return (n // m) * m


def _chip_config():
    """Returns (vmem_limit_bytes_or_None, data_budget_bytes, num_tensorcores)."""
    kind = ""
    try:
        kind = jax.devices()[0].device_kind.lower()
    except Exception:
        pass
    if "v7" in kind or kind.startswith("tpu7"):
        # v7x: 64 MiB VMEM per TensorCore, 2 TCs per chip.
        return 48 * 1024 * 1024, 36 * 1024 * 1024, 2
    if "v6" in kind or "v5" in kind:
        # v5e / v5p / v6e: 128 MiB VMEM per TensorCore.
        return 100 * 1024 * 1024, 72 * 1024 * 1024, 1
    # Unknown chip / CPU interpret mode: stay under the default scoped limit.
    return None, 12 * 1024 * 1024, 1


# --------------------------------------------------------------------------
# One-shot kernel: full spatial extent per block, fused single pass over x.
# --------------------------------------------------------------------------
def _oneshot_kernel(x_ref, w_ref, b_ref, o_ref, *, eps, inv_hw):
    # x_ref: (blk_bc, HW); w_ref / b_ref: (blk_bc, 1) per-block tiles.
    xf = x_ref[...].astype(jnp.float32)
    s = jnp.sum(xf, axis=-1, keepdims=True)
    q = jnp.sum(xf * xf, axis=-1, keepdims=True)
    mean = s * inv_hw
    var = jnp.maximum(q * inv_hw - mean * mean, 0.0)          # biased variance
    scale = lax.rsqrt(var + eps) * w_ref[...]
    shift = b_ref[...] - mean * scale
    o_ref[...] = (xf * scale + shift).astype(o_ref.dtype)


# --------------------------------------------------------------------------
# Two-pass fallback (very large H*W): pass 1 = stats, pass 2 = normalize.
# --------------------------------------------------------------------------
def _stats_kernel(x_ref, w_ref, b_ref, scale_ref, shift_ref, sum_sc, sq_sc,
                  *, eps, hw, inv_hw, blk_hw, mask_cols):
    j = pl.program_id(1)

    xf = x_ref[...].astype(jnp.float32)
    if mask_cols:
        # Mask columns past the true spatial extent (partial edge block).
        col = j * blk_hw + lax.broadcasted_iota(jnp.int32, xf.shape, 1)
        xf = jnp.where(col < hw, xf, 0.0)

    first = j == 0
    s = jnp.where(first, 0.0, sum_sc[...]) + jnp.sum(xf, axis=-1, keepdims=True)
    q = jnp.where(first, 0.0, sq_sc[...]) + jnp.sum(xf * xf, axis=-1, keepdims=True)
    sum_sc[...] = s
    sq_sc[...] = q

    # Recomputed every step on the resident output block; only the values from
    # the final spatial step are written back to HBM.
    mean = s * inv_hw
    var = jnp.maximum(q * inv_hw - mean * mean, 0.0)          # biased variance
    scale = lax.rsqrt(var + eps) * w_ref[...]
    scale_ref[...] = scale
    shift_ref[...] = b_ref[...] - mean * scale


def _normalize_kernel(x_ref, scale_ref, shift_ref, o_ref):
    xf = x_ref[...].astype(jnp.float32)
    o_ref[...] = (xf * scale_ref[...] + shift_ref[...]).astype(o_ref.dtype)


# --------------------------------------------------------------------------
# Wrapper
# --------------------------------------------------------------------------
def adaptive_instance_norm_2d(x, weight, bias, eps=1e-5, *,
                              two_pass=None, max_spatial_block=None):
    """AdaIN forward.  x: (B, C, H, W); weight, bias: (B*C,)."""
    B, C, H, W = x.shape
    BC, HW = B * C, H * W
    assert weight.shape == (BC,) and bias.shape == (BC,)

    vmem_limit, data_budget, num_tc = _chip_config()

    x2 = x.reshape(BC, HW)                        # keep HBM dtype (bf16 stays bf16)
    in_bytes = x2.dtype.itemsize
    out_bytes = in_bytes
    # Sublane packing multiple: 8 rows for 4-byte, 16 for 2-byte, 32 for 1-byte.
    sub = {4: 8, 2: 16, 1: 32}.get(in_bytes, 8)
    bc_pad = _round_up(BC, sub)

    w2 = weight.astype(jnp.float32).reshape(BC, 1)
    b2 = bias.astype(jnp.float32).reshape(BC, 1)

    # Per-element VMEM charge of a one-shot row block: double-buffered input +
    # output tiles, plus one f32 working copy inside the kernel.
    row_bytes = HW * (2 * (in_bytes + out_bytes) + 4)

    if two_pass is None:
        two_pass = sub * row_bytes > data_budget

    if not two_pass:
        # -------- one-shot path --------
        blk_bc = _round_down(data_budget // row_bytes, sub)
        blk_bc = max(sub, min(blk_bc, 2048, bc_pad))
        n_bc = math.ceil(BC / blk_bc)
        # On multi-TensorCore chips (v7x) make sure the "parallel" row axis has
        # at least num_tc steps so both cores get work.
        if num_tc > 1 and n_bc < num_tc and bc_pad >= num_tc * sub:
            n_bc = num_tc
        # Re-balance: equal-height, sublane-aligned blocks (avoids one TC /
        # one step getting a tiny leftover block).
        if n_bc > 1:
            blk_bc = _round_up(math.ceil(bc_pad / n_bc), sub)
            n_bc = math.ceil(BC / blk_bc)

        kernel = functools.partial(_oneshot_kernel, eps=float(eps), inv_hw=1.0 / HW)
        out2 = pl.pallas_call(
            kernel,
            out_shape=jax.ShapeDtypeStruct((BC, HW), x.dtype),
            grid_spec=pltpu.PrefetchScalarGridSpec(
                num_scalar_prefetch=0,
                grid=(n_bc,),
                in_specs=[
                    pl.BlockSpec((blk_bc, HW), lambda i: (i, 0)),
                    pl.BlockSpec((blk_bc, 1), lambda i: (i, 0)),
                    pl.BlockSpec((blk_bc, 1), lambda i: (i, 0)),
                ],
                out_specs=pl.BlockSpec((blk_bc, HW), lambda i: (i, 0)),
            ),
            compiler_params=pltpu.CompilerParams(
                dimension_semantics=("parallel",),
                vmem_limit_bytes=vmem_limit,
            ),
            cost_estimate=pl.CostEstimate(
                flops=7 * BC * HW,
                transcendentals=BC,
                bytes_accessed=BC * HW * (in_bytes + out_bytes),
            ),
        )(x2, w2, b2)
        return out2.reshape(B, C, H, W)

    # -------- two-pass fallback (spatial chunking) --------
    # Taller row blocks than the minimum: fewer grid steps, fewer tiny
    # (blk_bc, 1) stat stores, multi-MiB DMAs in both passes.
    blk_bc = max(sub, min(_round_up(128, sub), bc_pad))
    n_bc = math.ceil(BC / blk_bc)

    if HW < 128:
        blk_hw_stats = blk_hw_norm = HW
    else:
        hw_cap = max(128, _round_down(HW, 128))
        # Pass 1 (stats) only streams the input (+ f32 working copy); pass 2
        # also writes an output tile, so its chunks are correspondingly smaller.
        blk_hw_stats = _round_down(data_budget // (blk_bc * (2 * in_bytes + 4)), 128)
        blk_hw_norm = _round_down(
            data_budget // (blk_bc * (2 * (in_bytes + out_bytes) + 4)), 128)
        blk_hw_stats = max(128, min(blk_hw_stats, hw_cap))
        blk_hw_norm = max(128, min(blk_hw_norm, hw_cap))
        if max_spatial_block is not None:
            cap = max(128, _round_down(max_spatial_block, 128))
            blk_hw_stats = min(blk_hw_stats, cap)
            blk_hw_norm = min(blk_hw_norm, cap)
    n_hw_stats = math.ceil(HW / blk_hw_stats)
    n_hw_norm = math.ceil(HW / blk_hw_norm)

    stats = functools.partial(
        _stats_kernel, eps=float(eps), hw=HW, inv_hw=1.0 / HW,
        blk_hw=blk_hw_stats, mask_cols=(n_hw_stats * blk_hw_stats != HW))
    scale2, shift2 = pl.pallas_call(
        stats,
        out_shape=(jax.ShapeDtypeStruct((BC, 1), jnp.float32),
                   jax.ShapeDtypeStruct((BC, 1), jnp.float32)),
        grid_spec=pltpu.PrefetchScalarGridSpec(
            num_scalar_prefetch=0,
            grid=(n_bc, n_hw_stats),                 # reduction axis last
            in_specs=[
                pl.BlockSpec((blk_bc, blk_hw_stats), lambda i, j: (i, j)),
                pl.BlockSpec((blk_bc, 1), lambda i, j: (i, 0)),
                pl.BlockSpec((blk_bc, 1), lambda i, j: (i, 0)),
            ],
            out_specs=(pl.BlockSpec((blk_bc, 1), lambda i, j: (i, 0)),
                       pl.BlockSpec((blk_bc, 1), lambda i, j: (i, 0))),
            scratch_shapes=[pltpu.VMEM((blk_bc, 1), jnp.float32),
                            pltpu.VMEM((blk_bc, 1), jnp.float32)],
        ),
        compiler_params=pltpu.CompilerParams(
            dimension_semantics=("parallel", "arbitrary"),
            vmem_limit_bytes=vmem_limit,
        ),
        cost_estimate=pl.CostEstimate(
            flops=3 * BC * HW, transcendentals=BC,
            bytes_accessed=BC * HW * in_bytes,
        ),
    )(x2, w2, b2)

    out2 = pl.pallas_call(
        _normalize_kernel,
        out_shape=jax.ShapeDtypeStruct((BC, HW), x.dtype),
        grid_spec=pltpu.PrefetchScalarGridSpec(
            num_scalar_prefetch=0,
            grid=(n_bc, n_hw_norm),
            in_specs=[
                pl.BlockSpec((blk_bc, blk_hw_norm), lambda i, j: (i, j)),
                pl.BlockSpec((blk_bc, 1), lambda i, j: (i, 0)),
                pl.BlockSpec((blk_bc, 1), lambda i, j: (i, 0)),
            ],
            out_specs=pl.BlockSpec((blk_bc, blk_hw_norm), lambda i, j: (i, j)),
        ),
        compiler_params=pltpu.CompilerParams(
            dimension_semantics=("parallel", "parallel"),
            vmem_limit_bytes=vmem_limit,
        ),
        cost_estimate=pl.CostEstimate(
            flops=2 * BC * HW, transcendentals=0,
            bytes_accessed=BC * HW * (in_bytes + out_bytes),
        ),
    )(x2, scale2, shift2)
    return out2.reshape(B, C, H, W)


# --------------------------------------------------------------------------
# Reference + demo
# --------------------------------------------------------------------------
def _reference(x, weight, bias, eps=1e-5):
    B, C, H, W = x.shape
    xr = x.reshape(B * C, H * W).astype(jnp.float32)
    mean = xr.mean(axis=-1, keepdims=True)
    var = ((xr - mean) ** 2).mean(axis=-1, keepdims=True)
    y = (xr - mean) * lax.rsqrt(var + eps)
    y = y * weight.reshape(-1, 1).astype(jnp.float32) \
        + bias.reshape(-1, 1).astype(jnp.float32)
    return y.reshape(B, C, H, W)


if __name__ == "__main__":
    key = jax.random.PRNGKey(0)

    def _run_case(idx, shape, dtype, atol, rtol, **kwargs):
        B, C, H, W = shape
        k = jax.random.fold_in(key, idx)
        kx, kw_, kb = jax.random.split(k, 3)
        x = jax.random.normal(kx, shape, dtype=jnp.float32).astype(dtype)
        weight = jax.random.normal(kw_, (B * C,), dtype=jnp.float32) * 0.5 + 1.0
        bias = jax.random.normal(kb, (B * C,), dtype=jnp.float32) * 0.1

        out = adaptive_instance_norm_2d(x, weight, bias, **kwargs)
        out = jax.block_until_ready(out)
        ref = _reference(x.astype(jnp.float32), weight, bias)

        assert out.shape == shape
        assert out.dtype == dtype
        assert jnp.allclose(out.astype(jnp.float32), ref, atol=atol, rtol=rtol), \
            f"mismatch vs reference in case {idx} {shape} {dtype}"

    # 1) primary small shape from the module spec (one-shot path)
    _run_case(0, (2, 4, 16, 16), jnp.float32, 1e-4, 1e-4)
    # 2) BC not a multiple of 8, HW not a multiple of 128 (partial blocks)
    _run_case(1, (3, 3, 10, 12), jnp.float32, 1e-4, 1e-4)
    # 3) forced two-pass fallback with spatial chunking + edge masking
    _run_case(2, (2, 5, 16, 20), jnp.float32, 1e-4, 1e-4,
              two_pass=True, max_spatial_block=128)
    # 4) bf16 HBM traffic, f32 in-kernel stats (16-row sublane packing)
    _run_case(3, (2, 4, 16, 16), jnp.bfloat16, 5e-2, 2e-2)

    print("KERNEL_OK")
</pallas_src>

<mosaic_0001>
module attributes {stable_mosaic.version = 11 : i64} {
  func.func @_oneshot_kernel(%arg0: i32, %arg1: memref<8x256xf32, #tpu.memory_space<vmem>>, %arg2: memref<8x1xf32, #tpu.memory_space<vmem>>, %arg3: memref<8x1xf32, #tpu.memory_space<vmem>>, %arg4: memref<8x256xf32, #tpu.memory_space<vmem>>) attributes {dimension_semantics = [#tpu.dimension_semantics<parallel>], iteration_bounds = array<i64: 1>, scalar_prefetch = 0 : i64, scratch_operands = 0 : i64, tpu.core_type = #tpu.core_type<tc>, window_params = [{transform_indices = @transform_0, window_bounds = array<i64: 8, 256>}, {transform_indices = @transform_1, window_bounds = array<i64: 8, 1>}, {transform_indices = @transform_2, window_bounds = array<i64: 8, 1>}, {transform_indices = @transform_3, window_bounds = array<i64: 8, 256>}]} {
    %c0 = arith.constant 0 : index
    %c0_0 = arith.constant 0 : index
    %0 = vector.load %arg1[%c0, %c0_0] : memref<8x256xf32, #tpu.memory_space<vmem>>, vector<8x256xf32>
    %cst = arith.constant dense<0.000000e+00> : vector<8xf32>
    %1 = vector.multi_reduction <add>, %0, %cst [1] : vector<8x256xf32> to vector<8xf32>
    %2 = vector.shape_cast %1 : vector<8xf32> to vector<8x1xf32>
    %3 = arith.mulf %0, %0 : vector<8x256xf32>
    %cst_1 = arith.constant dense<0.000000e+00> : vector<8xf32>
    %4 = vector.multi_reduction <add>, %3, %cst_1 [1] : vector<8x256xf32> to vector<8xf32>
    %5 = vector.shape_cast %4 : vector<8xf32> to vector<8x1xf32>
    %cst_2 = arith.constant 3.906250e-03 : f32
    %6 = vector.broadcast %cst_2 : f32 to vector<8x1xf32>
    %7 = arith.mulf %2, %6 : vector<8x1xf32>
    %cst_3 = arith.constant 3.906250e-03 : f32
    %8 = vector.broadcast %cst_3 : f32 to vector<8x1xf32>
    %9 = arith.mulf %5, %8 : vector<8x1xf32>
    %10 = arith.mulf %7, %7 : vector<8x1xf32>
    %11 = arith.subf %9, %10 : vector<8x1xf32>
    %cst_4 = arith.constant 0.000000e+00 : f32
    %12 = vector.broadcast %cst_4 : f32 to vector<8x1xf32>
    %13 = arith.maximumf %11, %12 : vector<8x1xf32>
    %cst_5 = arith.constant 9.99999974E-6 : f32
    %14 = vector.broadcast %cst_5 : f32 to vector<8x1xf32>
    %15 = arith.addf %13, %14 : vector<8x1xf32>
    %16 = math.rsqrt %15 : vector<8x1xf32>
    %c0_6 = arith.constant 0 : index
    %c0_7 = arith.constant 0 : index
    %17 = vector.load %arg2[%c0_6, %c0_7] : memref<8x1xf32, #tpu.memory_space<vmem>>, vector<8x1xf32>
    %18 = arith.mulf %16, %17 : vector<8x1xf32>
    %c0_8 = arith.constant 0 : index
    %c0_9 = arith.constant 0 : index
    %19 = vector.load %arg3[%c0_8, %c0_9] : memref<8x1xf32, #tpu.memory_space<vmem>>, vector<8x1xf32>
    %20 = arith.mulf %7, %18 : vector<8x1xf32>
    %21 = arith.subf %19, %20 : vector<8x1xf32>
    %22 = vector.broadcast %18 : vector<8x1xf32> to vector<8x256xf32>
    %23 = arith.mulf %0, %22 : vector<8x256xf32>
    %24 = vector.broadcast %21 : vector<8x1xf32> to vector<8x256xf32>
    %25 = arith.addf %23, %24 : vector<8x256xf32>
    %c0_10 = arith.constant 0 : index
    %c0_11 = arith.constant 0 : index
    %26 = vector.load %arg4[%c0_10, %c0_11] : memref<8x256xf32, #tpu.memory_space<vmem>>, vector<8x256xf32>
    tpu.vector_store %arg4[%c0_10, %c0_11], %25 {strides = array<i32>} : memref<8x256xf32, #tpu.memory_space<vmem>>, vector<8x256xf32>,
    return
  }
  func.func @transform_0(%arg0: i32) -> (i32, i32) {
    %c0_i32 = arith.constant 0 : i32
    %c0_i32_0 = arith.constant 0 : i32
    return %arg0, %c0_i32 : i32, i32
  }
  func.func @transform_1(%arg0: i32) -> (i32, i32) {
    %c0_i32 = arith.constant 0 : i32
    %c0_i32_0 = arith.constant 0 : i32
    return %arg0, %c0_i32 : i32, i32
  }
  func.func @transform_2(%arg0: i32) -> (i32, i32) {
    %c0_i32 = arith.constant 0 : i32
    %c0_i32_0 = arith.constant 0 : i32
    return %arg0, %c0_i32 : i32, i32
  }
  func.func @transform_3(%arg0: i32) -> (i32, i32) {
    %c0_i32 = arith.constant 0 : i32
    %c0_i32_0 = arith.constant 0 : i32
    return %arg0, %c0_i32 : i32, i32
  }
}

</mosaic_0001>

<bundles_post_ra>
// kernel: tpu_custom_call.1
= control target key start
LH: loop header
LB: loop body
LE: loop exit
PB: predicated region body
PF: predicated region fallthrough
CT: control target
= control target key end

     0   :  { %s143_s0 = inlined_call_operand.vmem [shape: f32[8,256], index: 0, kind: input, shape index: {}]   ;;  %s144_s1 = inlined_call_operand.vmem [shape: f32[8,1], index: 1, kind: input, shape index: {}]   ;;  %s145_s2 = inlined_call_operand.vmem [shape: f32[8,1], index: 2, kind: input, shape index: {}]   ;;  %s146_s3 = inlined_call_operand.hbm [shape: f32[8,256], index: 3, kind: output, shape index: {}]  }
   0x1   :  { %v15_v0 = vld [vmem:[%s143_s0] sm:$0xff]  ;;  %v16_v1 = vld [vmem:[%s143_s0 + $0x8] sm:$0xff] }
   0x2   :  { %8 = vsyncpa [#allocation3], 0  ;;  %v17_v2 = vadd.f32 %v16_v1, %v15_v0  ;;  %v20_v3 = vmul.f32 %v15_v0, %v15_v0  ;;  %v21_v4 = vmul.f32 %v16_v1, %v16_v1  ;;  %v97_v6 = vmov 0   ;;  %v32_v15 = vld [vmem:[%s144_s1] sm:$0xff]  ;;  %s98_s19 = smov [#allocation2]  }
   0x3   :  { %69 = vset.pattern.permute.xlu1 %v97_v6  ;;  %70 = vset.pattern.permute.xlu0 %v97_v6  ;;  %v34_v18 = vld [vmem:[%s145_s2] sm:$0xff]  ;;  %s59_s20 = sshll.u32 %s98_s19, 4  ;;  %s60_s20 = int_to_ptr.vmem [resolvable:$true] %s59_s20 }
   0x4   :  { %18 = vadd.xlane.f32.xlu0 %v17_v2  ;;  %v22_v5 = vadd.f32 %v21_v4, %v20_v3  ;;  %s73_s1 = scalar_lea.vmem %s60_s20, 256  ;;  %p78_p1 = scmp.lt.s32.totalorder %s60_s20, %s60_s20 }
   0x5   :  { %p74_p0 = scmp.ne.s32.totalorder %s60_s20, %s73_s1  ;;  %p79_p2 = scmp.lt.s32.totalorder %s73_s1, %s73_s1 }
   0x7   :  { %p80_p3 = por %p79_p2, %p78_p1 }
   0x8   :  { %23 = vadd.xlane.f32.xlu0 %v22_v5 }
   0x9   :  { %p81_p4 = pnand %p80_p3, %p74_p0 }
  0x91   :  { %v19_v7 = vpop.xlane.xlu0 %18 }
  0x92   :  { %v25_v8 = vmul.f32 0.00390625, %v19_v7 }
  0x94   :  { %v27_v10 = vmul.f32 %v25_v8, %v25_v8 }
  0x95   :  { %v24_v9 = vpop.xlane.xlu0 %23 }
  0x96   :  { %v26_v11 = vmul.f32 0.00390625, %v24_v9 }
  0x98   :  { %v28_v12 = vsub.f32 %v26_v11, %v27_v10 }
  0x9a   :  { %v29_v13 = vmax.f32 %v28_v12, 0.0 }
  0x9c   :  { %v30_v14 = vadd.f32 1e-05, %v29_v13 }
  0x9e   :  { %71 = vrsqrt.f32 %v30_v14 }
  0xa8   :  { %v72_v16 = vpop.eup %71 }
  0xa9   :  { %v33_v17 = vmul.f32 %v72_v16, %v32_v15 }
  0xab   :  { %39 = vperm.xlu1 %69, %v33_v17   ;;  %v35_v19 = vmul.f32 %v33_v17, %v25_v8 }
  0xad   :  { %v36_v20 = vsub.f32 %v34_v18, %v35_v19 }
  0xaf   :  { %46 = vperm.xlu1 %69, %v36_v20  }
 0x12a   :  { %v40_v21 = vpop.permute.xlu1 %39 }
 0x12b   :  { %v42_v22 = vmul.f32 %v40_v21, %v15_v0  ;;  %v43_v23 = vmul.f32 %v40_v21, %v16_v1 }
 0x12e   :  { %v47_v24 = vpop.permute.xlu1 %46 }
 0x12f   :  { %v49_v25 = vadd.f32 %v47_v24, %v42_v22  ;;  %v50_v26 = vadd.f32 %v47_v24, %v43_v23 }
 0x131   :  { %51 = vst [vmem:[#allocation2] sm:$0xff] %v49_v25  ;;  %52 = vst [vmem:[#allocation2 + $0x8] sm:$0xff] %v50_v26 }
 0x132   :  { %84 = shalt.err (!%p81_p4)
}
 0x133   :  { %s85_s22 = scalar_lea.hbm %s146_s3, 256 }
 0x134   :  { %p86_p5 = scmp.ne.s32.totalorder %s146_s3, %s85_s22  ;;  %p89_p6 = scmp.lt.u32.totalorder %s85_s22, %s146_s3 }
 0x136   :  { %p91_p7 = pnand %p89_p6, %p86_p5 }
 0x138   :  { %94 = shalt.err (!%p91_p7)
}
 0x139   :  { %62 = dma.vmem_to_hbm [thread:$0]  %s60_s20, 256, %s146_s3, [#allocation3]  }
 0x13a   :  { %95 = dma.done.wait [#allocation3], 256  }
 0x13b   :  { %96 = vsyncadd [#allocation3], 4294967040 }
 0x13c   :  { %66 = vsyncpa [#allocation3], 1 }

</bundles_post_ra>
